<compile_context>
chip_gen: v5e
topology: v5e:2x2
jax: 0.10.0
libtpu: 0.0.40
codegen_flags: <defaults>
</compile_context>

<pallas_src>
import jax
import jax.numpy as jnp
from jax.experimental import pallas as pl
from jax.experimental.pallas import tpu as pltpu


def _attention_kernel(x_ref, wqkv_ref, bqkv_ref, bias_ref, o_ref):
    """Single invocation processes the whole (tiny) problem.

    x_ref    : (B*T, C)    bf16  VMEM   (batch folded into M)
    wqkv_ref : (C, 3H)     bf16  VMEM   (fused [Wq*scale | Wk | Wv], already transposed)
    bqkv_ref : (1, 3H)     f32   VMEM   (fused [bq*scale | bk | bv])
    bias_ref : (B*T, B*T)  f32   VMEM   (block-diagonal causal additive bias: 0 / -1e30)
    o_ref    : (B*T, H)    f32   VMEM   (lane-dense 2-D output; reshaped in the wrapper)
    """
    H = o_ref.shape[1]

    # Fused QKV projection: one MXU matmul with N = 3H lanes, f32 accumulate.
    qkv = jnp.dot(x_ref[...], wqkv_ref[...], preferred_element_type=jnp.float32)
    qkv = qkv + bqkv_ref[...]                                  # (M, 3H) f32

    # Split (scale already folded into the Q slice).  At H=16 these sub-vreg slices
    # are noise; align segments to 128 lanes if H grows (see header note).
    q = qkv[:, 0 * H:1 * H].astype(jnp.bfloat16)               # (M, H)
    k = qkv[:, 1 * H:2 * H].astype(jnp.bfloat16)               # (M, H)
    v = qkv[:, 2 * H:3 * H].astype(jnp.bfloat16)               # (M, H)

    # Scores: single 2-D matmul, contraction on the LAST dim of both operands
    # (q · kᵀ without an explicit transpose of k).
    s = jax.lax.dot_general(
        q, k,
        dimension_numbers=(((1,), (1,)), ((), ())),
        preferred_element_type=jnp.float32,
    )                                                          # (M, M) f32

    # Fused causal + same-batch mask as a single additive bias (precomputed in wrapper).
    # Every row keeps its diagonal unmasked, so max-subtraction below stays safe.
    s = s + bias_ref[...]

    # Numerically-stable softmax in f32; reciprocal on the EUP (~free slot).
    m = jnp.max(s, axis=-1, keepdims=True)
    e = jnp.exp(s - m)
    denom = jnp.sum(e, axis=-1, keepdims=True)
    p = e * pl.reciprocal(denom, approx=True)

    # Dropout is identity in eval mode.

    # Attention output: one (M, M) x (M, H) matmul, bf16 MXU with f32 accumulate.
    y = jnp.dot(p.astype(jnp.bfloat16), v, preferred_element_type=jnp.float32)
    o_ref[...] = y.astype(o_ref.dtype)


def attention_block(x, wq, bq, wk, bk, wv, bv):
    """x: (B, T, C) float32.  w*: (H, C) PyTorch-layout weights, b*: (H,)."""
    B, T, C = x.shape
    H = wq.shape[0]
    M = B * T
    scale = jnp.float32(H) ** jnp.float32(-0.5)

    # Fuse QKV into a single (C, 3H) weight / (1, 3H) bias; fold the 1/sqrt(H) score
    # scale into the Q slice so the kernel never scales the (M, M) scores on the VPU.
    wqkv = jnp.concatenate([wq.T * scale, wk.T, wv.T], axis=1).astype(jnp.bfloat16)  # (C, 3H)
    bqkv = jnp.concatenate([bq * scale, bk, bv])[None, :].astype(jnp.float32)        # (1, 3H)

    # Fold batch into the matmul M dimension.
    x2d = x.reshape(M, C).astype(jnp.bfloat16)

    # Block-diagonal causal additive bias over the flattened (B*T) axis: entry (r, c) is
    # allowed iff same batch block AND c <= r.  Static-shape constant (folds under jit).
    row = jnp.arange(M, dtype=jnp.int32)[:, None]
    col = jnp.arange(M, dtype=jnp.int32)[None, :]
    allowed = jnp.logical_and((row // T) == (col // T), col <= row)
    mask_bias = jnp.where(allowed, jnp.float32(0.0), jnp.float32(-1e30))             # (M, M)

    out2d = pl.pallas_call(
        _attention_kernel,
        out_shape=jax.ShapeDtypeStruct((M, H), x.dtype),
        in_specs=[
            pl.BlockSpec(memory_space=pltpu.MemorySpace.VMEM),
            pl.BlockSpec(memory_space=pltpu.MemorySpace.VMEM),
            pl.BlockSpec(memory_space=pltpu.MemorySpace.VMEM),
            pl.BlockSpec(memory_space=pltpu.MemorySpace.VMEM),
        ],
        out_specs=pl.BlockSpec(memory_space=pltpu.MemorySpace.VMEM),
    )(x2d, wqkv, bqkv, mask_bias)

    # Free layout plumbing back to the module's (B, T, H) output.
    return out2d.reshape(B, T, H)


def _reference(x, wq, bq, wk, bk, wv, bv):
    """Pure-JAX f32 reference mirroring the PyTorch forward (eval mode)."""
    q = x @ wq.T + bq
    k = x @ wk.T + bk
    v = x @ wv.T + bv
    wei = (q @ jnp.swapaxes(k, -2, -1)) * (k.shape[-1] ** -0.5)
    T = x.shape[1]
    tril = jnp.tril(jnp.ones((T, T), jnp.float32))
    wei = jnp.where(tril == 0, -jnp.inf, wei)
    wei = jax.nn.softmax(wei, axis=-1)
    return wei @ v


if __name__ == "__main__":
    # Small shapes consistent with the module: B=2, context_size=T=8,
    # embedding_dim=C=32, head_dim=H=16.
    B, T, C, H = 2, 8, 32, 16

    key = jax.random.PRNGKey(0)
    kx, kq, kbq, kk, kbk, kv, kbv = jax.random.split(key, 7)

    x = jax.random.normal(kx, (B, T, C), dtype=jnp.float32)

    # Deterministic parameter init (PyTorch-Linear-like uniform bound).
    bound = 1.0 / (C ** 0.5)
    wq = jax.random.uniform(kq, (H, C), jnp.float32, -bound, bound)
    bq = jax.random.uniform(kbq, (H,), jnp.float32, -bound, bound)
    wk = jax.random.uniform(kk, (H, C), jnp.float32, -bound, bound)
    bk = jax.random.uniform(kbk, (H,), jnp.float32, -bound, bound)
    wv = jax.random.uniform(kv, (H, C), jnp.float32, -bound, bound)
    bv = jax.random.uniform(kbv, (H,), jnp.float32, -bound, bound)

    out = attention_block(x, wq, bq, wk, bk, wv, bv)
    out = jax.block_until_ready(out)

    ref = _reference(x, wq, bq, wk, bk, wv, bv)
    assert out.shape == (B, T, H), out.shape
    # bf16 MXU operands (f32 accumulate) -> looser tolerance than pure f32.
    max_err = float(jnp.max(jnp.abs(out - ref)))
    assert jnp.allclose(out, ref, atol=5e-2, rtol=5e-2), max_err

    print("KERNEL_OK")
</pallas_src>

<mosaic_0001>
module attributes {stable_mosaic.version = 11 : i64} {
  func.func @_attention_kernel(%arg0: memref<16x32xbf16, #tpu.memory_space<vmem>>, %arg1: memref<32x48xbf16, #tpu.memory_space<vmem>>, %arg2: memref<1x48xf32, #tpu.memory_space<vmem>>, %arg3: memref<16x16xf32, #tpu.memory_space<vmem>>, %arg4: memref<16x16xf32, #tpu.memory_space<vmem>>) attributes {dimension_semantics = [], scalar_prefetch = 0 : i64, scratch_operands = 0 : i64, tpu.core_type = #tpu.core_type<tc>} {
    %c0 = arith.constant 0 : index
    %c0_0 = arith.constant 0 : index
    %0 = vector.load %arg0[%c0, %c0_0] : memref<16x32xbf16, #tpu.memory_space<vmem>>, vector<16x32xbf16>
    %c0_1 = arith.constant 0 : index
    %c0_2 = arith.constant 0 : index
    %1 = vector.load %arg1[%c0_1, %c0_2] : memref<32x48xbf16, #tpu.memory_space<vmem>>, vector<32x48xbf16>
    %cst = arith.constant dense<0.000000e+00> : vector<16x48xf32>
    %2 = tpu.matmul %0, %1, %cst {dimension_numbers = #tpu.dot_dimension_numbers<[1], [0], [0], [1], [0, 0, 1, 1], [], []>} : vector<16x32xbf16>, vector<32x48xbf16>, vector<16x48xf32> -> vector<16x48xf32>
    %c0_3 = arith.constant 0 : index
    %c0_4 = arith.constant 0 : index
    %3 = vector.load %arg2[%c0_3, %c0_4] : memref<1x48xf32, #tpu.memory_space<vmem>>, vector<1x48xf32>
    %4 = vector.broadcast %3 : vector<1x48xf32> to vector<16x48xf32>
    %5 = arith.addf %2, %4 : vector<16x48xf32>
    %6 = vector.extract_strided_slice %5 {offsets = [0, 0], sizes = [16, 16], strides = [1, 1]} : vector<16x48xf32> to vector<16x16xf32>
    %7 = arith.truncf %6 : vector<16x16xf32> to vector<16x16xbf16>
    %8 = vector.extract_strided_slice %5 {offsets = [0, 16], sizes = [16, 16], strides = [1, 1]} : vector<16x48xf32> to vector<16x16xf32>
    %9 = arith.truncf %8 : vector<16x16xf32> to vector<16x16xbf16>
    %10 = vector.extract_strided_slice %5 {offsets = [0, 32], sizes = [16, 16], strides = [1, 1]} : vector<16x48xf32> to vector<16x16xf32>
    %11 = arith.truncf %10 : vector<16x16xf32> to vector<16x16xbf16>
    %cst_5 = arith.constant dense<0.000000e+00> : vector<16x16xf32>
    %12 = tpu.matmul %7, %9, %cst_5 {dimension_numbers = #tpu.dot_dimension_numbers<[1], [1], [0], [0], [0, 0, 1, 0], [], []>} : vector<16x16xbf16>, vector<16x16xbf16>, vector<16x16xf32> -> vector<16x16xf32>
    %c0_6 = arith.constant 0 : index
    %c0_7 = arith.constant 0 : index
    %13 = vector.load %arg3[%c0_6, %c0_7] : memref<16x16xf32, #tpu.memory_space<vmem>>, vector<16x16xf32>
    %14 = arith.addf %12, %13 : vector<16x16xf32>
    %cst_8 = arith.constant dense<0xFF800000> : vector<16xf32>
    %15 = vector.multi_reduction <maximumf>, %14, %cst_8 [1] : vector<16x16xf32> to vector<16xf32>
    %16 = vector.shape_cast %15 : vector<16xf32> to vector<16x1xf32>
    %17 = vector.broadcast %16 : vector<16x1xf32> to vector<16x16xf32>
    %18 = arith.subf %14, %17 : vector<16x16xf32>
    %19 = math.exp %18 : vector<16x16xf32>
    %cst_9 = arith.constant dense<0.000000e+00> : vector<16xf32>
    %20 = vector.multi_reduction <add>, %19, %cst_9 [1] : vector<16x16xf32> to vector<16xf32>
    %21 = vector.shape_cast %20 : vector<16xf32> to vector<16x1xf32>
    %22 = tpu.reciprocal %21 {approx = true} : vector<16x1xf32> -> vector<16x1xf32>
    %23 = vector.broadcast %22 : vector<16x1xf32> to vector<16x16xf32>
    %24 = arith.mulf %19, %23 : vector<16x16xf32>
    %25 = arith.truncf %24 : vector<16x16xf32> to vector<16x16xbf16>
    %cst_10 = arith.constant dense<0.000000e+00> : vector<16x16xf32>
    %26 = tpu.matmul %25, %11, %cst_10 {dimension_numbers = #tpu.dot_dimension_numbers<[1], [0], [0], [1], [0, 0, 1, 1], [], []>} : vector<16x16xbf16>, vector<16x16xbf16>, vector<16x16xf32> -> vector<16x16xf32>
    %c0_11 = arith.constant 0 : index
    %c0_12 = arith.constant 0 : index
    %27 = vector.load %arg4[%c0_11, %c0_12] : memref<16x16xf32, #tpu.memory_space<vmem>>, vector<16x16xf32>
    tpu.vector_store %arg4[%c0_11, %c0_12], %26 {strides = array<i32>} : memref<16x16xf32, #tpu.memory_space<vmem>>, vector<16x16xf32>,
    return
  }
}

</mosaic_0001>

<bundles_post_ra>
// kernel: tpu_custom_call.1
= control target key start
LH: loop header
LB: loop body
LE: loop exit
PB: predicated region body
PF: predicated region fallthrough
CT: control target
= control target key end

     0   :  { %9 = vsyncpa [#allocation3], 0  ;;  %s407_s0 = inlined_call_operand.hbm [shape: bf16[16,32], index: 0, kind: input, shape index: {}]   ;;  %s408_s1 = inlined_call_operand.hbm [shape: bf16[32,48], index: 1, kind: input, shape index: {}]   ;;  %s409_s2 = inlined_call_operand.vmem [shape: f32[1,48], index: 2, kind: input, shape index: {}]   ;;  %s410_s3 = inlined_call_operand.hbm [shape: f32[16,16], index: 3, kind: input, shape index: {}]   ;;  %s411_s4 = inlined_call_operand.hbm [shape: f32[16,16], index: 4, kind: output, shape index: {}]  }
   0x1   :  { %10 = vsyncpa [#allocation6], 0 }
   0x2   :  { %11 = vsyncpa [#allocation4], 0  ;;  %s29_s17 = sshll.u32 %s408_s1, 4  ;;  %s342_s18 = smov [#allocation5]   ;;  %s30_s17 = int_to_ptr.hbm [resolvable:$true] %s29_s17 }
   0x3   :  { %s31_s19 = sshll.u32 %s342_s18, 4  ;;  %s16_s22 = sshll.u32 %s407_s0, 4  ;;  %s32_s19 = int_to_ptr.vmem [resolvable:$true] %s31_s19  ;;  %s17_s22 = int_to_ptr.hbm [resolvable:$true] %s16_s22 }
   0x4   :  { %s343_s23 = smov 64   ;;  %s344_s24 = smov 4  }
   0x5   :  { %37 = dma.hbm_to_vmem [thread:$0]  %s30_s17, 256, %s32_s19, [#allocation6], %s343_s23, %s343_s23, %s344_s24  }
   0x6   :  { %s345_s25 = smov [#allocation2]   ;;  %s44_s29 = sshll.u32 %s410_s3, 4  ;;  %s45_s29 = int_to_ptr.hbm [resolvable:$true] %s44_s29 }
   0x7   :  { %s18_s26 = sshll.u32 %s345_s25, 4  ;;  %s346_s1 = smov [#allocation7]   ;;  %s19_s26 = int_to_ptr.vmem [resolvable:$true] %s18_s26 }
   0x8   :  { %24 = dma.hbm_to_vmem [thread:$0]  %s17_s22, 128, %s19_s26, [#allocation3], %s343_s23, %s343_s23, %s344_s24  }
   0x9   :  { %s46_s30 = sshll.u32 %s346_s1, 4  ;;  %s347_s5 = smov 128   ;;  %s47_s30 = int_to_ptr.vmem [resolvable:$true] %s46_s30 }
   0xa   :  { %s348_s6 = smov 8  }
   0xb   :  { %52 = dma.hbm_to_vmem [thread:$0]  %s45_s29, 256, %s47_s30, [#allocation6], %s347_s5, %s347_s5, %s348_s6  }
   0xc   :  { %336 = dma.done.wait [#allocation3], 128  }
   0xd   :  { %337 = vsyncadd [#allocation3], 4294967168 }
   0xe   :  { %338 = dma.done.wait [#allocation6], 512  }
   0xf   :  { %339 = vsyncadd [#allocation6], 4294966784  ;;  %v220_v0 = vld [vmem:[#allocation5 + $0x8] sm:$0xff]  ;;  %v219_v1 = vld [vmem:[#allocation5] sm:$0xff]  ;;  %vm93_vm0 = vcmask 261120   ;;  %s349_s7 = smov 112  }
  0x10   :  { %103 = vmatpush.bf16.msra.mxu0 %v220_v0  ;;  %v218_v2 = vld [vmem:[#allocation2] sm:$0xff]  ;;  %vm117_vm1 = vcmask 130048   ;;  %v112_v11 = vld [vmem:[#allocation7] sm:$0xff]  ;;  %s351_s8 = smov [#allocation8]   ;;  %s189_s12 = sshll.u32 %s411_s4, 4  ;;  %s190_s12 = int_to_ptr.hbm [resolvable:$true] %s189_s12 }
  0x11   :  { %v231_v4 = vld [vmem:[%s409_s2] ss:$0 sm:$0xff]  ;;  %s350_s2 = smov 96   ;;  %s187_s9 = sshll.u32 %s351_s8, 4  ;;  %s188_s9 = int_to_ptr.vmem [resolvable:$true] %s187_s9 }
  0x12   :  { %v113_v15 = vld [vmem:[#allocation7 + $0x8] sm:$0xff] }
  0x14   :  { %104 = vmatpush.bf16.msra.mxu0 %v219_v1 }
  0x17   :  { %215 = vmatmul.msk.bf16.vlgmr.msra.gmra.mxu0 %vm93_vm0, %v218_v2 }
  0x94   :  { %v106_v3 = vpop.f32.mrf.mxu0 }
  0x95   :  { %v107_v6 = vadd.f32 %v231_v4, %v106_v3 }
  0x9c   :  { %v108_v5 = vpop.f32.mrf.mxu0 }
  0x9d   :  { %v109_v7 = vadd.f32 %v231_v4, %v108_v5 }
  0x9f   :  { %v111_v8 = vpack.c.bf16 %v109_v7, %v107_v6 }
  0xa1   :  { %115 = vrot.lane.b32.xlu0 %v111_v8, %s349_s7 }
 0x113   :  { %v116_v9 = vpop.permute.xlu0 %115 }
 0x114   :  { %v122_v10 = vsel %vm117_vm1, %v116_v9, 0 }
 0x115   :  { %131 = vmatpush.bf16.xpose.msra.mxu1 %v122_v10 }
 0x11c   :  { %216 = vmatmul.msk.bf16.vlgmr.msra.gmra.mxu1 %vm117_vm1, %v111_v8 }
 0x199   :  { %v133_v12 = vpop.f32.mrf.mxu1 }
 0x19a   :  { %v134_v13 = vadd.f32 %v133_v12, %v112_v11 }
 0x19c   :  { %v138_v14 = vsel %vm117_vm1, %v134_v13, -inf }
 0x19d   :  { %139 = vmax.xlane.f32.xlu0 %v138_v14 }
 0x1a1   :  { %v135_v16 = vpop.f32.mrf.mxu1 }
 0x1a2   :  { %v136_v17 = vadd.f32 %v135_v16, %v113_v15 }
 0x1a4   :  { %v141_v18 = vsel %vm117_vm1, %v136_v17, -inf }
 0x1a5   :  { %142 = vmax.xlane.f32.xlu1 %v141_v18 }
 0x210   :  { %v140_v19 = vpop.xlane.xlu0 %139 }
 0x211   :  { %v144_v20 = vsub.f32 %v134_v13, %v140_v19 }
 0x213   :  { %v146_v21 = vmul.f32 1.442695, %v144_v20 }
 0x215   :  { %232 = vpow2.f32 %v146_v21 }
 0x218   :  { %v143_v22 = vpop.xlane.xlu1 %142 }
 0x219   :  { %v145_v23 = vsub.f32 %v136_v17, %v143_v22 }
 0x21b   :  { %v233_v24 = vpop.eup %232  ;;  %v148_v25 = vmul.f32 1.442695, %v145_v23 }
 0x21c   :  { %v150_v26 = vsel %vm117_vm1, %v233_v24, 0.0 }
 0x21d   :  { %234 = vpow2.f32 %v148_v25  ;;  %151 = vadd.xlane.f32.xlu1 %v150_v26 }
 0x223   :  { %v235_v27 = vpop.eup %234 }
 0x224   :  { %v153_v28 = vsel %vm117_vm1, %v235_v27, 0.0 }
 0x225   :  { %154 = vadd.xlane.f32.xlu2 %v153_v28 }
 0x23d   :  { %161 = vrot.lane.b32.xlu2 %v111_v8, %s350_s2 }
 0x290   :  { %v152_v29 = vpop.xlane.xlu1 %151 }
 0x291   :  { %236 = vrcp.f32 %v152_v29 }
 0x297   :  { %v237_v31 = vpop.eup %236 }
 0x298   :  { %v155_v30 = vpop.xlane.xlu2 %154  ;;  %v158_v34 = vmul.f32 %v237_v31, %v233_v24 }
 0x299   :  { %238 = vrcp.f32 %v155_v30 }
 0x29f   :  { %v239_v32 = vpop.eup %238 }
 0x2a0   :  { %v162_v33 = vpop.permute.xlu2 %161  ;;  %v159_v35 = vmul.f32 %v239_v32, %v235_v27 }
 0x2a1   :  { %174 = vmatpush.bf16.msra.mxu2 %v162_v33 }
 0x2a2   :  { %v160_v36 = vpack.c.bf16 %v159_v35, %v158_v34 }
 0x2a4   :  { %217 = vmatmul.msk.bf16.vlgmr.msra.gmra.mxu2 %vm117_vm1, %v160_v36 }
 0x327   :  { %v176_v37 = vpop.f32.mrf.mxu2 }
 0x328   :  { %181 = vst.msk [vmem:[#allocation8] sm:$0xff] %vm117_vm1, %v176_v37 }
 0x32f   :  { %v178_v38 = vpop.f32.mrf.mxu2 }
 0x330   :  { %182 = vst.msk [vmem:[#allocation8 + $0x8] sm:$0xff] %vm117_vm1, %v178_v38 }
 0x331   :  { %195 = dma.vmem_to_hbm [thread:$0]  %s188_s9, 256, %s190_s12, [#allocation4], %s347_s5, %s347_s5, %s348_s6  }
 0x332   :  { %340 = dma.done.wait [#allocation4], 256  }
 0x333   :  { %341 = vsyncadd [#allocation4], 4294967040 }
 0x334   :  { %200 = vsyncpa [#allocation3], 1 }
 0x335   :  { %201 = vsyncpa [#allocation6], 1 }
 0x336   :  { %202 = vsyncpa [#allocation4], 1 }

</bundles_post_ra>
